<compile_context>
chip_gen: v5e
topology: v5e:2x2
jax: 0.10.0
libtpu: 0.0.40
codegen_flags: <defaults>
</compile_context>

<pallas_src>
import jax
import jax.numpy as jnp
from jax.experimental import pallas as pl
from jax.experimental.pallas import tpu as pltpu

B, S, D_IN = 2, 8, 9          # x1: (B, 8, 9)
O4 = 4                        # linear4: 9 -> 4
O3 = 9                        # linear3: 8 -> 9
O2 = 3                        # linear2: (first 4 in-cols used) -> 3


def _up8(n):
    return -(-n // 8) * 8


def _layout(bsz):
    """Row offsets of each parameter block inside the packed (rows, 128) slab.

    Every block starts at lane 0 and at a row offset that is a multiple of 8
    (sublane-tile aligned), so kernel unpack slices need no relayout.
    """
    r_w4t = 0                              # (D_IN, O4) = (9, 4)   linear4 weight^T
    r_w3  = _up8(r_w4t + D_IN)             # (O3, S)    = (9, 8)   linear3 weight
    r_w2t = _up8(r_w3 + O3)                # (O4, O2)   = (4, 3)   linear2 weight^T
    r_b4  = _up8(r_w2t + O4)               # (bsz*S, O4)           linear4 bias, pre-broadcast
    r_b3  = _up8(r_b4 + bsz * S)           # (O3, O4)   = (9, 4)   linear3 bias, pre-broadcast
    r_b2  = _up8(r_b3 + O3)                # (bsz, O2)             linear2 bias, pre-broadcast
    rows  = _up8(r_b2 + bsz)
    return r_w4t, r_w3, r_w2t, r_b4, r_b3, r_b2, rows


def pack_params(w4, b4, w3, b3, w2, b2, bsz):
    """Build the packed parameter slab ONCE at init (hoisted off the per-call path)."""
    r_w4t, r_w3, r_w2t, r_b4, r_b3, r_b2, rows = _layout(bsz)
    p = jnp.zeros((rows, 128), jnp.float32)
    p = p.at[r_w4t:r_w4t + D_IN, 0:O4].set(w4.T)                                    # (9, 4)
    p = p.at[r_w3:r_w3 + O3, 0:S].set(w3)                                           # (9, 8)
    p = p.at[r_w2t:r_w2t + O4, 0:O2].set(w2.T)                                      # (4, 3)
    p = p.at[r_b4:r_b4 + bsz * S, 0:O4].set(
        jnp.broadcast_to(b4[None, :], (bsz * S, O4)))                               # (B*S, 4)
    p = p.at[r_b3:r_b3 + O3, 0:O4].set(jnp.broadcast_to(b3[:, None], (O3, O4)))     # (9, 4)
    p = p.at[r_b2:r_b2 + bsz, 0:O2].set(jnp.broadcast_to(b2[None, :], (bsz, O2)))   # (B, 3)
    return p


def model_kernel(x_ref, p_ref, out_ref):
    bsz, s, d = x_ref.shape
    r_w4t, r_w3, r_w2t, r_b4, r_b3, r_b2, _ = _layout(bsz)

    # ---- unpack (static, lane-0, 8-row-aligned slices: zero-relayout) ----
    w4t  = p_ref[r_w4t:r_w4t + D_IN, 0:O4]       # (9, 4)   linear4 weight^T
    w3m  = p_ref[r_w3:r_w3 + O3, 0:S]            # (9, 8)   linear3 weight (untransposed)
    w2t  = p_ref[r_w2t:r_w2t + O4, 0:O2]         # (4, 3)   linear2 weight^T (first 4 in-cols)
    b4bc = p_ref[r_b4:r_b4 + bsz * s, 0:O4]      # (B*S, 4) linear4 bias, pre-broadcast
    b3bc = p_ref[r_b3:r_b3 + O3, 0:O4]           # (9, 4)   linear3 bias, pre-broadcast (transposed form)
    b2bc = p_ref[r_b2:r_b2 + bsz, 0:O2]          # (B, 3)   linear2 bias, pre-broadcast

    # v1 = cos(x); linear4 as ONE 2-D MXU dot with (batch, seq) folded into M.
    # The (B, 8, 9) -> (B*8, 9) flatten is a layout no-op (sublane extent 8 == one tile).
    v1f = jnp.cos(x_ref[...]).reshape(bsz * s, d)                         # (B*S, 9)
    v2f = jnp.dot(v1f, w4t, preferred_element_type=jnp.float32) + b4bc    # (B*S, 4)

    # permute(0, 2, 1) + linear3, kept in the transposed orientation:
    #   v4[b]^T = w3 @ v2[b] + b3[:, None]  -> (9, 4); no activation transposes needed.
    # The reference's max over v4's last dim is then a max over the sublane (j) axis.
    v8_rows = []
    for b in range(bsz):
        v2b  = v2f[b * s:(b + 1) * s, :]                                          # (8, 4)
        v4tb = jnp.dot(w3m, v2b, preferred_element_type=jnp.float32) + b3bc       # (9, 4)
        v5tb = jax.nn.sigmoid(v4tb)                                               # (9, 4)
        v8_rows.append(jnp.max(v5tb, axis=0, keepdims=True))                      # (1, 4)
    # TODO(synk): dead v6/v7 branch (v1.view(1, 480) -> linear1 -> sigmoid) from the
    # reference is unused and shape-inconsistent for any rank-3 x1 -> not implemented.
    v8 = jnp.concatenate(v8_rows, axis=0)                                         # (B, 4)
    v9 = jnp.dot(v8, w2t, preferred_element_type=jnp.float32) + b2bc              # (B, 3)
    out_ref[...] = v9.astype(out_ref.dtype)


@jax.jit
def run_model(x, packed):
    bsz = x.shape[0]
    vmem = pl.BlockSpec(memory_space=pltpu.MemorySpace.VMEM)
    # Tiny problem (one vreg of work): single program, whole operands resident in VMEM.
    # A batch grid with "parallel" semantics only pays off at a few hundred+ rows.
    return pl.pallas_call(
        model_kernel,
        out_shape=jax.ShapeDtypeStruct((bsz, O2), jnp.float32),
        in_specs=[vmem, vmem],
        out_specs=vmem,
    )(x, packed)


def _linear_init(kw, kb, out_f, in_f):
    bound = 1.0 / (in_f ** 0.5)
    w = jax.random.uniform(kw, (out_f, in_f), jnp.float32, -bound, bound)
    b = jax.random.uniform(kb, (out_f,), jnp.float32, -bound, bound)
    return w, b


def reference(x, w4, b4, w3, b3, w2, b2):
    v1 = jnp.cos(x)
    v2 = jnp.einsum('bsd,od->bso', v1, w4) + b4
    v3 = jnp.transpose(v2, (0, 2, 1))
    v4 = jnp.einsum('bsd,od->bso', v3, w3) + b3
    v5 = jax.nn.sigmoid(v4)
    v8 = jnp.max(v5, axis=-1)
    return jnp.dot(v8, w2.T) + b2


if __name__ == "__main__":
    key = jax.random.PRNGKey(0)
    kx, k1w, k1b, k2w, k2b, k3w, k3b, k4w, k4b = jax.random.split(key, 9)

    # Parameters exactly as declared in __init__ (deterministic init).
    w1, b1 = _linear_init(k1w, k1b, 5, 3)        # linear1 (dead branch, unused)
    w2_full, b2 = _linear_init(k2w, k2b, 3, 5)   # linear2 declared Linear(5, 3)
    w3, b3 = _linear_init(k3w, k3b, 9, 8)        # linear3
    w4, b4 = _linear_init(k4w, k4b, 4, 9)        # linear4

    # TODO(synk): linear2's declared in_features=5 mismatches v8's feature dim 4;
    # we use the first 4 input columns of the declared weight (documented deviation).
    w2 = w2_full[:, :O4]

    x1 = jax.random.normal(kx, (B, S, D_IN), dtype=jnp.float32)

    # Pack parameters ONCE at init (not in the per-call path).
    packed = jax.block_until_ready(pack_params(w4, b4, w3, b3, w2, b2, B))

    out = jax.block_until_ready(run_model(x1, packed))
    ref = reference(x1, w4, b4, w3, b3, w2, b2)
    assert out.shape == (B, O2)
    assert jnp.allclose(out, ref, atol=1e-5, rtol=1e-5)
    print("KERNEL_OK")
</pallas_src>

<mosaic_0001>
module attributes {stable_mosaic.version = 11 : i64} {
  func.func @model_kernel(%arg0: memref<2x8x9xf32, #tpu.memory_space<vmem>>, %arg1: memref<80x128xf32, #tpu.memory_space<vmem>>, %arg2: memref<2x3xf32, #tpu.memory_space<vmem>>) attributes {dimension_semantics = [], scalar_prefetch = 0 : i64, scratch_operands = 0 : i64, tpu.core_type = #tpu.core_type<tc>} {
    %c0 = arith.constant 0 : index
    %c0_0 = arith.constant 0 : index
    %0 = vector.load %arg1[%c0, %c0_0] : memref<80x128xf32, #tpu.memory_space<vmem>>, vector<9x4xf32>
    %c16 = arith.constant 16 : index
    %c0_1 = arith.constant 0 : index
    %1 = vector.load %arg1[%c16, %c0_1] : memref<80x128xf32, #tpu.memory_space<vmem>>, vector<9x8xf32>
    %c32 = arith.constant 32 : index
    %c0_2 = arith.constant 0 : index
    %2 = vector.load %arg1[%c32, %c0_2] : memref<80x128xf32, #tpu.memory_space<vmem>>, vector<4x3xf32>
    %c40 = arith.constant 40 : index
    %c0_3 = arith.constant 0 : index
    %3 = vector.load %arg1[%c40, %c0_3] : memref<80x128xf32, #tpu.memory_space<vmem>>, vector<16x4xf32>
    %c56 = arith.constant 56 : index
    %c0_4 = arith.constant 0 : index
    %4 = vector.load %arg1[%c56, %c0_4] : memref<80x128xf32, #tpu.memory_space<vmem>>, vector<9x4xf32>
    %c72 = arith.constant 72 : index
    %c0_5 = arith.constant 0 : index
    %5 = vector.load %arg1[%c72, %c0_5] : memref<80x128xf32, #tpu.memory_space<vmem>>, vector<2x3xf32>
    %c0_6 = arith.constant 0 : index
    %c0_7 = arith.constant 0 : index
    %c0_8 = arith.constant 0 : index
    %6 = vector.load %arg0[%c0_6, %c0_7, %c0_8] : memref<2x8x9xf32, #tpu.memory_space<vmem>>, vector<2x8x9xf32>
    %7 = math.cos %6 : vector<2x8x9xf32>
    %8 = vector.shape_cast %7 : vector<2x8x9xf32> to vector<16x9xf32>
    %cst = arith.constant dense<0.000000e+00> : vector<16x4xf32>
    %9 = tpu.matmul %8, %0, %cst {dimension_numbers = #tpu.dot_dimension_numbers<[1], [0], [0], [1], [0, 0, 1, 1], [], []>} : vector<16x9xf32>, vector<9x4xf32>, vector<16x4xf32> -> vector<16x4xf32>
    %10 = arith.addf %9, %3 : vector<16x4xf32>
    %11 = vector.extract_strided_slice %10 {offsets = [0, 0], sizes = [8, 4], strides = [1, 1]} : vector<16x4xf32> to vector<8x4xf32>
    %cst_9 = arith.constant dense<0.000000e+00> : vector<9x4xf32>
    %12 = tpu.matmul %1, %11, %cst_9 {dimension_numbers = #tpu.dot_dimension_numbers<[1], [0], [0], [1], [0, 0, 1, 1], [], []>} : vector<9x8xf32>, vector<8x4xf32>, vector<9x4xf32> -> vector<9x4xf32>
    %13 = arith.addf %12, %4 : vector<9x4xf32>
    %14 = arith.negf %13 : vector<9x4xf32>
    %15 = math.exp %14 : vector<9x4xf32>
    %cst_10 = arith.constant 1.000000e+00 : f32
    %16 = vector.broadcast %cst_10 : f32 to vector<9x4xf32>
    %17 = arith.addf %16, %15 : vector<9x4xf32>
    %18 = arith.divf %16, %17 : vector<9x4xf32>
    %cst_11 = arith.constant dense<0xFF800000> : vector<4xf32>
    %19 = vector.multi_reduction <maximumf>, %18, %cst_11 [0] : vector<9x4xf32> to vector<4xf32>
    %20 = vector.shape_cast %19 : vector<4xf32> to vector<1x4xf32>
    %21 = vector.extract_strided_slice %10 {offsets = [8, 0], sizes = [8, 4], strides = [1, 1]} : vector<16x4xf32> to vector<8x4xf32>
    %cst_12 = arith.constant dense<0.000000e+00> : vector<9x4xf32>
    %22 = tpu.matmul %1, %21, %cst_12 {dimension_numbers = #tpu.dot_dimension_numbers<[1], [0], [0], [1], [0, 0, 1, 1], [], []>} : vector<9x8xf32>, vector<8x4xf32>, vector<9x4xf32> -> vector<9x4xf32>
    %23 = arith.addf %22, %4 : vector<9x4xf32>
    %24 = arith.negf %23 : vector<9x4xf32>
    %25 = math.exp %24 : vector<9x4xf32>
    %cst_13 = arith.constant 1.000000e+00 : f32
    %26 = vector.broadcast %cst_13 : f32 to vector<9x4xf32>
    %27 = arith.addf %26, %25 : vector<9x4xf32>
    %28 = arith.divf %26, %27 : vector<9x4xf32>
    %cst_14 = arith.constant dense<0xFF800000> : vector<4xf32>
    %29 = vector.multi_reduction <maximumf>, %28, %cst_14 [0] : vector<9x4xf32> to vector<4xf32>
    %30 = vector.shape_cast %29 : vector<4xf32> to vector<1x4xf32>
    %31 = tpu.concatenate %20, %30 in 0 : vector<1x4xf32>, vector<1x4xf32> -> vector<2x4xf32>
    %cst_15 = arith.constant dense<0.000000e+00> : vector<2x3xf32>
    %32 = tpu.matmul %31, %2, %cst_15 {dimension_numbers = #tpu.dot_dimension_numbers<[1], [0], [0], [1], [0, 0, 1, 1], [], []>} : vector<2x4xf32>, vector<4x3xf32>, vector<2x3xf32> -> vector<2x3xf32>
    %33 = arith.addf %32, %5 : vector<2x3xf32>
    %c0_16 = arith.constant 0 : index
    %c0_17 = arith.constant 0 : index
    %34 = vector.load %arg2[%c0_16, %c0_17] : memref<2x3xf32, #tpu.memory_space<vmem>>, vector<2x3xf32>
    tpu.vector_store %arg2[%c0_16, %c0_17], %33 {strides = array<i32>} : memref<2x3xf32, #tpu.memory_space<vmem>>, vector<2x3xf32>,
    return
  }
}

</mosaic_0001>

<bundles_post_ra>
// kernel: run_model.1
= control target key start
LH: loop header
LB: loop body
LE: loop exit
PB: predicated region body
PF: predicated region fallthrough
CT: control target
= control target key end

     0   :  { %7 = vsyncpa [#allocation3], 0  ;;  %s958_s0 = inlined_call_operand.hbm [shape: f32[2,8,9], index: 0, kind: input, shape index: {}]   ;;  %s959_s1 = inlined_call_operand.hbm [shape: f32[80,128], index: 1, kind: input, shape index: {}]   ;;  %s960_s2 = inlined_call_operand.hbm [shape: f32[2,3], index: 2, kind: output, shape index: {}]  }
   0x1   :  { %8 = vsyncpa [#allocation6], 0 }
   0x2   :  { %9 = vsyncpa [#allocation4], 0  ;;  %s14_s11 = sshll.u32 %s958_s0, 4  ;;  %s720_s12 = smov [#allocation2]   ;;  %s15_s11 = int_to_ptr.hbm [resolvable:$true] %s14_s11 }
   0x3   :  { %s16_s13 = sshll.u32 %s720_s12, 4  ;;  %s27_s16 = sshll.u32 %s959_s1, 4  ;;  %s17_s13 = int_to_ptr.vmem [resolvable:$true] %s16_s13  ;;  %s28_s16 = int_to_ptr.hbm [resolvable:$true] %s27_s16 }
   0x4   :  { %s721_s17 = smov 128   ;;  %s722_s18 = smov 8  }
   0x5   :  { %22 = dma.hbm_to_vmem [thread:$0]  %s15_s11, 256, %s17_s13, [#allocation3], %s721_s17, %s721_s17, %s722_s18  }
   0x6   :  { %s723_s19 = smov [#allocation5]  }
   0x7   :  { %s29_s20 = sshll.u32 %s723_s19, 4  ;;  %s30_s20 = int_to_ptr.vmem [resolvable:$true] %s29_s20 }
   0x8   :  { %35 = dma.hbm_to_vmem [thread:$0]  %s28_s16, 1280, %s30_s20, [#allocation6], %s721_s17, %s721_s17, %s722_s18  }
   0x9   :  { %714 = dma.done.wait [#allocation3], 256  }
   0xa   :  { %715 = vsyncadd [#allocation3], 4294967040 }
   0xb   :  { %716 = dma.done.wait [#allocation6], 1280  }
   0xc   :  { %717 = vsyncadd [#allocation6], 4294966016  ;;  %vm371_vm0 = vcmask 1040384   ;;  %v45_v0 = vld [vmem:[#allocation5 + $0x8] sm:$0x1]  ;;  %v44_v1 = vld [vmem:[#allocation5] sm:$0xff] }
   0xd   :  { %v753_v2 = vld [vmem:[#allocation2] sm:$0xff]  ;;  %601 = vmatpush.msk.msra.mxu0 %vm371_vm0, %v45_v0  ;;  %v758_v5 = vld [vmem:[#allocation2 + $0x8] sm:$0xff]  ;;  %v724_v25 = vmov 683565275   ;;  %v725_v27 = vmov 2475754826  }
   0xe   :  { %v56_v3 = vand.u32 2147483647, %v753_v2  ;;  %v59_v4 = vand.u32 2139095040, %v753_v2  ;;  %v210_v6 = vand.u32 2147483647, %v758_v5  ;;  %v213_v7 = vand.u32 2139095040, %v758_v5 }
   0xf   :  { %390 = vmatpush.msra.mxu0 %v44_v1  ;;  %v726_v29 = vmov 2131351028   ;;  %v727_v31 = vmov 2102212464   ;;  %v728_v33 = vmov 920167782  }
  0x10   :  { %v60_v8 = vshrl.u32 %v59_v4, 23  ;;  %v63_v9 = vand.u32 8388607, %v56_v3  ;;  %v214_v10 = vshrl.u32 %v213_v7, 23  ;;  %v217_v14 = vand.u32 8388607, %v210_v6 }
  0x11   :  { %v729_v42 = vmov 1326507024   ;;  %s731_s0 = smov [#allocation7]   ;;  %s584_s23 = sshll.u32 %s960_s2, 4  ;;  %s585_s23 = int_to_ptr.hbm [resolvable:$true] %s584_s23 }
  0x12   :  { %v595_v11 = vadd.s32 4294967169, %v60_v8  ;;  %v64_v12 = vor.u32 8388608, %v63_v9  ;;  %v598_v13 = vadd.s32 4294967169, %v214_v10  ;;  %v218_v19 = vor.u32 8388608, %v217_v14  ;;  %s582_s1 = sshll.u32 %s731_s0, 4  ;;  %s583_s1 = int_to_ptr.vmem [resolvable:$true] %s582_s1 }
  0x14   :  { %v66_v15 = vadd.s32 1, %v595_v11  ;;  %v220_v16 = vadd.s32 1, %v598_v13  ;;  %v766_v18 = vshll.u32 %v64_v12, 8  ;;  %v776_v36 = vshll.u32 %v218_v19, 8 }
  0x16   :  { %vm67_vm1 = vcmp.gt.s32.totalorder %v66_v15, 0  ;;  %vm221_vm2 = vcmp.gt.s32.totalorder %v220_v16, 0  ;;  %v105_v35 = vand.u32 65535, %v766_v18  ;;  %v106_v40 = vshrl.u32 %v766_v18, 16 }
  0x17   :  { %v68_v17 = vsel %vm67_vm1, %v66_v15, 0  ;;  %v222_v21 = vsel %vm221_vm2, %v220_v16, 0 }
  0x18   :  { %v70_v20 = vand.u32 31, %v68_v17  ;;  %v768_v22 = vshrl.u32 %v68_v17, 5  ;;  %v770_v23 = vand.u32 31, %v222_v21  ;;  %v794_v53 = vshrl.u32 %v222_v21, 5 }
  0x1a   :  { %v71_v24 = vsub.s32 32, %v70_v20  ;;  %v73_v26 = vshll.u32 %v724_v25, %v70_v20  ;;  %v76_v28 = vshll.u32 %v725_v27, %v70_v20  ;;  %v79_v30 = vshll.u32 %v726_v29, %v70_v20 }
  0x1b   :  { %v82_v32 = vshll.u32 %v727_v31, %v70_v20  ;;  %v85_v34 = vshll.u32 %v728_v33, %v70_v20  ;;  %vm88_vm3 = vcmp.lt.s32.totalorder %v768_v22, 1  ;;  %vm91_vm4 = vcmp.lt.s32.totalorder %v768_v22, 4 }
  0x1c   :  { %v74_v37 = vshrl.u32 %v725_v27, %v71_v24  ;;  %v77_v38 = vshrl.u32 %v726_v29, %v71_v24  ;;  %v80_v39 = vshrl.u32 %v727_v31, %v71_v24  ;;  %v83_v41 = vshrl.u32 %v728_v33, %v71_v24 }
  0x1d   :  { %v86_v43 = vshrl.u32 %v729_v42, %v71_v24  ;;  %v785_v47 = vsub.s32 32, %v770_v23  ;;  %v72_v48 = vshrl.u32 %v724_v25, %v71_v24  ;;  %vm90_vm5 = vcmp.lt.s32.totalorder %v768_v22, 3 }
  0x1e   :  { %v75_v44 = vor.u32 %v74_v37, %v73_v26  ;;  %v78_v45 = vor.u32 %v77_v38, %v76_v28  ;;  %v81_v46 = vor.u32 %v80_v39, %v79_v30  ;;  %v84_v49 = vor.u32 %v83_v41, %v82_v32 }
  0x1f   :  { %v87_v50 = vor.u32 %v86_v43, %v85_v34  ;;  %vm89_vm6 = vcmp.lt.s32.totalorder %v768_v22, 2  ;;  %v227_v56 = vshll.u32 %v724_v25, %v770_v23  ;;  %v230_v57 = vshll.u32 %v725_v27, %v770_v23 }
  0x20   :  { %v96_v51 = vsel %vm88_vm3, %v75_v44, %v78_v45  ;;  %v100_v52 = vsel %vm88_vm3, %v78_v45, %v81_v46  ;;  %v97_v54 = vsel %vm91_vm4, %v84_v49, 920167782  ;;  %v93_v58 = vsel %vm91_vm4, %v81_v46, 2102212464 }
  0x21   :  { %v101_v55 = vsel %vm91_vm4, %v87_v50, 1326507024  ;;  %v98_v59 = vsel %vm90_vm5, %v81_v46, %v97_v54  ;;  %v228_v61 = vshrl.u32 %v725_v27, %v785_v47  ;;  %v92_v62 = vsel %vm88_vm3, %v72_v48, %v75_v44 }
  0x22   :  { %v102_v60 = vsel %vm90_vm5, %v84_v49, %v101_v55  ;;  %v99_v63 = vsel %vm89_vm6, %v96_v51, %v98_v59  ;;  %v231_v1 = vshrl.u32 %v726_v29, %v785_v47  ;;  %v94_v10 = vsel %vm90_vm5, %v78_v45, %v93_v58 }
  0x23   :  { %v103_v0 = vsel %vm89_vm6, %v100_v52, %v102_v60  ;;  %v129_v8 = vand.u32 65535, %v99_v63  ;;  %v130_v9 = vshrl.u32 %v99_v63, 16  ;;  %v819_v11 = vor.u32 %v228_v61, %v227_v56 }
  0x24   :  { %v107_v4 = vand.u32 65535, %v103_v0  ;;  %v108_v7 = vshrl.u32 %v103_v0, 16  ;;  %v821_v12 = vor.u32 %v231_v1, %v230_v57  ;;  %v233_v13 = vshll.u32 %v726_v29, %v770_v23 }
  0x25   :  { %v234_v17 = vshrl.u32 %v727_v31, %v785_v47  ;;  %v131_v20 = vmul.u32 %v129_v8, %v105_v35  ;;  %v132_v21 = vmul.u32 %v130_v9, %v105_v35  ;;  %v133_v24 = vmul.u32 %v129_v8, %v106_v40 }
  0x26   :  { %v109_v14 = vmul.u32 %v107_v4, %v105_v35  ;;  %v110_v15 = vmul.u32 %v108_v7, %v105_v35  ;;  %v111_v16 = vmul.u32 %v107_v4, %v106_v40  ;;  %v112_v19 = vmul.u32 %v108_v7, %v106_v40 }
  0x27   :  { %v134_v30 = vmul.u32 %v130_v9, %v106_v40  ;;  %v135_v34 = vshll.u32 %v132_v21, 16  ;;  %v136_v37 = vshrl.u32 %v132_v21, 16  ;;  %v137_v38 = vshll.u32 %v133_v24, 16 }
  0x28   :  { %v113_v26 = vshll.u32 %v110_v15, 16  ;;  %v114_v27 = vshrl.u32 %v110_v15, 16  ;;  %v115_v28 = vshll.u32 %v111_v16, 16  ;;  %v116_v32 = vshrl.u32 %v111_v16, 16 }
  0x29   :  { %v138_v39 = vshrl.u32 %v133_v24, 16  ;;  %v236_v41 = vshll.u32 %v727_v31, %v770_v23  ;;  %v730_v43 = vmov 0   ;;  %vm139_vm8 = vc.u32 %v131_v20, %v135_v34 }
  0x2a   :  { %vm117_vm7 = vc.u32 %v109_v14, %v113_v26  ;;  %v119_v29 = vadd.s32 %v113_v26, %v109_v14  ;;  %v141_v35 = vadd.s32 %v135_v34, %v131_v20  ;;  %v237_v45 = vshrl.u32 %v728_v33, %v785_v47 }
  0x2b   :  { %v118_v44 = vsel %vm117_vm7, 1, %v730_v43  ;;  %v140_v40 = vsel %vm139_vm8, 1, %v730_v43  ;;  %v239_v48 = vshll.u32 %v728_v33, %v770_v23  ;;  %v235_v31 = vor.u32 %v234_v17, %v233_v13 }
  0x2c   :  { %v120_v46 = vadd.s32 %v118_v44, %v112_v19  ;;  %vm121_vm9 = vc.u32 %v119_v29, %v115_v28  ;;  %v142_v50 = vadd.s32 %v140_v40, %v134_v30  ;;  %vm143_vm10 = vc.u32 %v141_v35, %v137_v38 }
  0x2d   :  { %v122_v49 = vsel %vm121_vm9, 1, %v730_v43  ;;  %v144_v52 = vsel %vm143_vm10, 1, %v730_v43  ;;  %v238_v54 = vor.u32 %v237_v45, %v236_v41  ;;  %v240_v55 = vshrl.u32 %v729_v42, %v785_v47 }
  0x2e   :  { %v124_v51 = vadd.s32 %v122_v49, %v120_v46  ;;  %v838_v56 = vadd.s32 %v141_v35, %v137_v38  ;;  %v146_v57 = vadd.s32 %v144_v52, %v142_v50  ;;  %vm242_vm11 = vcmp.lt.s32.totalorder %v794_v53, 1 }
  0x2f   :  { %vm244_vm12 = vcmp.lt.s32.totalorder %v794_v53, 3  ;;  %v241_v33 = vor.u32 %v240_v55, %v239_v48  ;;  %vm243_vm13 = vcmp.lt.s32.totalorder %v794_v53, 2  ;;  %vm245_vm14 = vcmp.lt.s32.totalorder %v794_v53, 4 }
  0x30   :  { %v125_v23 = vadd.s32 %v124_v51, %v114_v27  ;;  %v95_v58 = vsel %vm89_vm6, %v92_v62, %v94_v10  ;;  %v147_v59 = vadd.s32 %v146_v57, %v136_v37  ;;  %v250_v42 = vsel %vm242_vm11, %v819_v11, %v821_v12 }
  0x31   :  { %v251_v60 = vsel %vm245_vm14, %v238_v54, 920167782  ;;  %v254_v0 = vsel %vm242_vm11, %v821_v12, %v235_v31  ;;  %v260_v22 = vshrl.u32 %v776_v36, 16  ;;  %v255_v4 = vsel %vm245_vm14, %v241_v33, 1326507024 }
  0x32   :  { %v852_v61 = vadd.s32 %v125_v23, %v116_v32  ;;  %v252_v63 = vsel %vm244_vm12, %v235_v31, %v251_v60  ;;  %v148_v62 = vadd.s32 %v147_v59, %v138_v39  ;;  %v259_v7 = vand.u32 65535, %v776_v36 }
  0x33   :  { %v253_v1 = vsel %vm243_vm13, %v250_v42, %v252_v63  ;;  %v149_v8 = vmul.u32 %v766_v18, %v95_v58  ;;  %v256_v9 = vsel %vm244_vm12, %v238_v54, %v255_v4  ;;  %v226_v41 = vshrl.u32 %v724_v25, %v785_v47 }
  0x34   :  { %vm151_vm15 = vc.u32 %v852_v61, %v838_v56  ;;  %v283_v10 = vand.u32 65535, %v253_v1  ;;  %v152_v13 = vadd.s32 1, %v148_v62  ;;  %v257_v14 = vsel %vm243_vm13, %v254_v0, %v256_v9 }
  0x35   :  { %v284_v15 = vshrl.u32 %v253_v1, 16  ;;  %v261_v16 = vand.u32 65535, %v257_v14  ;;  %v262_v17 = vshrl.u32 %v257_v14, 16  ;;  %v247_v40 = vsel %vm245_vm14, %v235_v31, 2102212464 }
  0x36   :  { %v287_v19 = vmul.u32 %v283_v10, %v260_v22  ;;  %v153_v20 = vsel %vm151_vm15, %v152_v13, %v148_v62  ;;  %v285_v21 = vmul.u32 %v283_v10, %v259_v7  ;;  %v246_v25 = vsel %vm242_vm11, %v226_v41, %v819_v11 }
  0x37   :  { %v286_v24 = vmul.u32 %v284_v15, %v259_v7  ;;  %v154_v26 = vadd.s32 %v153_v20, %v149_v8  ;;  %v263_v18 = vmul.u32 %v261_v16, %v259_v7  ;;  %v264_v27 = vmul.u32 %v262_v17, %v259_v7 }
  0x38   :  { %v265_v28 = vmul.u32 %v261_v16, %v260_v22  ;;  %v288_v30 = vmul.u32 %v284_v15, %v260_v22  ;;  %v291_v34 = vshll.u32 %v287_v19, 16  ;;  %v266_v38 = vmul.u32 %v262_v17, %v260_v22 }
  0x39   :  { %v289_v32 = vshll.u32 %v286_v24, 16  ;;  %v155_v37 = vadd.s32 536870912, %v154_v26  ;;  %v267_v29 = vshll.u32 %v264_v27, 16  ;;  %v268_v51 = vshrl.u32 %v264_v27, 16 }
  0x3a   :  { %v269_v39 = vshll.u32 %v265_v28, 16  ;;  %v290_v54 = vshrl.u32 %v286_v24, 16  ;;  %v248_v31 = vsel %vm244_vm12, %v821_v12, %v247_v40  ;;  %v270_v23 = vshrl.u32 %v265_v28, 16 }
  0x3b   :  { %vm293_vm1 = vc.u32 %v285_v21, %v289_v32  ;;  %v295_v44 = vadd.s32 %v289_v32, %v285_v21  ;;  %v874_v35 = vshrl.u32 %v155_v37, 30  ;;  %vm271_vm2 = vc.u32 %v263_v18, %v267_v29 }
  0x3c   :  { %v273_v45 = vadd.s32 %v267_v29, %v263_v18  ;;  %v294_v46 = vsel %vm293_vm1, 1, %v730_v43  ;;  %v272_v48 = vsel %vm271_vm2, 1, %v730_v43  ;;  %v292_v58 = vshrl.u32 %v287_v19, 16 }
  0x3d   :  { %v296_v49 = vadd.s32 %v294_v46, %v288_v30  ;;  %vm297_vm3 = vc.u32 %v295_v44, %v291_v34  ;;  %v157_v50 = vshll.u32 %v874_v35, 30  ;;  %v274_v52 = vadd.s32 %v272_v48, %v266_v38 }
  0x3e   :  { %vm275_vm4 = vc.u32 %v273_v45, %v269_v39  ;;  %v298_v55 = vsel %vm297_vm3, 1, %v730_v43  ;;  %v299_v63 = vadd.s32 %v295_v44, %v291_v34  ;;  %v249_v11 = vsel %vm243_vm13, %v246_v25, %v248_v31 }
  0x3f   :  { %v276_v47 = vsel %vm275_vm4, 1, %v730_v43  ;;  %v158_v57 = vsub.s32 %v154_v26, %v157_v50  ;;  %v300_v59 = vadd.s32 %v298_v55, %v296_v49  ;;  %v303_v4 = vmul.u32 %v776_v36, %v249_v11 }
  0x40   :  { %v278_v33 = vadd.s32 %v276_v47, %v274_v52  ;;  %v150_v8 = vadd.s32 %v838_v56, %v852_v61  ;;  %vm58_vm9 = vcmp.lt.s32.totalorder %v753_v2, 0  ;;  %vm900_vm10 = vcmp.le.f32.partialorder %v56_v3, 0.7853982 }
  0x41   :  { %vm159_vm5 = vcmp.lt.s32.totalorder %v158_v57, 0  ;;  %v160_v42 = vsub.s32 0, %v158_v57  ;;  %v301_v0 = vadd.s32 %v300_v59, %v290_v54  ;;  %v180_v39 = vsub.s32 4, %v874_v35 }
  0x42   :  { %v279_v60 = vadd.s32 %v278_v33, %v268_v51  ;;  %vm212_vm13 = vcmp.lt.s32.totalorder %v758_v5, 0  ;;  %vm918_vm15 = vcmp.le.f32.partialorder %v210_v6, 0.7853982  ;;  %vm199_vm2 = vweird.f32 %v753_v2 }
  0x43   :  { %v161_v22 = vsel %vm159_vm5, %v160_v42, %v158_v57  ;;  %v302_v1 = vadd.s32 %v301_v0, %v292_v58  ;;  %v181_v50 = vsel %vm58_vm9, %v180_v39, %v874_v35  ;;  %vm364_vm3 = vcmask 72704  }
  0x44   :  { %v280_v62 = vadd.s32 %v279_v60, %v270_v23  ;;  %v162_v43 = vclz %v161_v22  ;;  %v183_v55 = vsel %vm900_vm10, 0, %v181_v50 }
  0x45   :  { %v306_v7 = vadd.s32 1, %v302_v1  ;;  %v200_v42 = vand.u32 3, %v183_v55 }
  0x46   :  { %vm305_vm6 = vc.u32 %v280_v62, %v299_v63  ;;  %v596_v12 = vadd.s32 4294967294, %v162_v43  ;;  %v304_v45 = vadd.s32 %v299_v63, %v280_v62 }
  0x47   :  { %v307_v9 = vsel %vm305_vm6, %v306_v7, %v302_v1  ;;  %vm205_vm12 = vcmp.eq.s32.totalorder %v200_v42, 2  ;;  %vm202_vm14 = vcmp.eq.s32.totalorder %v200_v42, 0  ;;  %vm201_vm1 = vcmp.lt.s32.totalorder %v200_v42, 2  ;;  %v48_v42 = vld [vmem:[#allocation5 + $0x20] sm:$0xf] }
  0x48   :  { %vm597_vm7 = vcmp.lt.s32.totalorder %v596_v12, 0  ;;  %v308_v13 = vadd.s32 %v307_v9, %v303_v4 }
  0x49   :  { %v165_v10 = vsel %vm597_vm7, 0, %v596_v12  ;;  %vm353_vm7 = vweird.f32 %v758_v5 }
  0x4a   :  { %v166_v14 = vsub.s32 32, %v165_v10  ;;  %v167_v53 = vshll.u32 %v158_v57, %v165_v10  ;;  %v170_v15 = vsub.s32 4294967266, %v165_v10  ;;  %v309_v16 = vadd.s32 536870912, %v308_v13 }
  0x4c   :  { %v168_v17 = vshrl.u32 %v150_v8, %v166_v14  ;;  %v171_v19 = vadd.s32 127, %v170_v15  ;;  %v894_v20 = vshrl.u32 %v309_v16, 30 }
  0x4e   :  { %v169_v21 = vor.u32 %v168_v17, %v167_v53  ;;  %v172_v36 = vshll.u32 %v171_v19, 23  ;;  %v311_v24 = vshll.u32 %v894_v20, 30  ;;  %v334_v14 = vsub.s32 4, %v894_v20 }
  0x50   :  { %v173_v26 = vor.u32 4788187, %v172_v36  ;;  %v176_v18 = vcvt.s32.f32 %v169_v21  ;;  %v312_v27 = vsub.s32 %v308_v13, %v311_v24 }
  0x52   :  { %v174_v56 = vand.u32 2147483647, %v173_v26  ;;  %vm313_vm8 = vcmp.lt.s32.totalorder %v312_v27, 0  ;;  %v314_v61 = vsub.s32 0, %v312_v27 }
  0x54   :  { %v177_v28 = vmul.f32 %v176_v18, %v174_v56  ;;  %v315_v30 = vsel %vm313_vm8, %v314_v61, %v312_v27  ;;  %vm398_vm8 = vcmask 64512  }
  0x55   :  { %v316_v37 = vclz %v315_v30 }
  0x56   :  { %v178_v34 = vxor.u32 2147483648, %v177_v28 }
  0x57   :  { %v599_v29 = vadd.s32 4294967294, %v316_v37 }
  0x58   :  { %v179_v38 = vsel %vm58_vm9, %v178_v34, %v177_v28  ;;  %vm551_vm9 = vcmask 1043456  }
  0x59   :  { %v182_v41 = vsel %vm900_vm10, %v753_v2, %v179_v38  ;;  %vm600_vm11 = vcmp.lt.s32.totalorder %v599_v29, 0  ;;  %v335_v2 = vsel %vm212_vm13, %v334_v14, %v894_v20  ;;  %612 = vmatpush.msk.msra.mxu3 %vm551_vm9, %v48_v42 }
  0x5a   :  { %v184_v44 = vmul.f32 %v182_v41, %v182_v41  ;;  %v319_v46 = vsel %vm600_vm11, 0, %v599_v29  ;;  %v337_v24 = vsel %vm918_vm15, 0, %v335_v2 }
  0x5b   :  { %v320_v48 = vsub.s32 32, %v319_v46  ;;  %v321_v49 = vshll.u32 %v312_v27, %v319_v46  ;;  %v324_v51 = vsub.s32 4294967266, %v319_v46  ;;  %v354_v61 = vand.u32 3, %v337_v24 }
  0x5c   :  { %v185_v3 = vmul.f32 -0.001358992, %v184_v44  ;;  %v192_v40 = vmul.f32 -0.00019511016, %v184_v44 }
  0x5d   :  { %v322_v47 = vshrl.u32 %v304_v45, %v320_v48  ;;  %v325_v54 = vadd.s32 127, %v324_v51  ;;  %vm359_vm4 = vcmp.eq.s32.totalorder %v354_v61, 2  ;;  %vm356_vm5 = vcmp.eq.s32.totalorder %v354_v61, 0  ;;  %v49_v45 = vld [vmem:[#allocation5 + $0x28] sm:$0xff]  ;;  %v47_v48 = vld [vmem:[#allocation5 + $0x18] sm:$0x1] }
  0x5e   :  { %v186_v52 = vadd.f32 0.041655596, %v185_v3  ;;  %v193_v25 = vadd.f32 0.008332121, %v192_v40  ;;  %vm355_vm6 = vcmp.lt.s32.totalorder %v354_v61, 2  ;;  %v46_v40 = vld [vmem:[#allocation5 + $0x10] sm:$0xff] }
  0x5f   :  { %v323_v23 = vor.u32 %v322_v47, %v321_v49  ;;  %v326_v33 = vshll.u32 %v325_v54, 23  ;;  %v50_v49 = vld [vmem:[#allocation5 + $0x30] sm:$0xff]  ;;  %v52_v54 = vld [vmem:[#allocation5 + $0x40] sm:$0x1] }
  0x60   :  { %v187_v57 = vmul.f32 %v186_v52, %v184_v44  ;;  %v194_v31 = vmul.f32 %v193_v25, %v184_v44 }
  0x61   :  { %v327_v60 = vor.u32 4788187, %v326_v33  ;;  %v330_v63 = vcvt.s32.f32 %v323_v23 }
  0x62   :  { %v188_v58 = vadd.f32 -0.4999988, %v187_v57  ;;  %v195_v59 = vadd.f32 -0.16666654, %v194_v31 }
  0x63   :  { %v328_v35 = vand.u32 2147483647, %v327_v60 }
  0x64   :  { %v189_v11 = vmul.f32 %v188_v58, %v184_v44  ;;  %v196_v0 = vmul.f32 %v195_v59, %v184_v44 }
  0x65   :  { %v331_v43 = vmul.f32 %v330_v63, %v328_v35 }
  0x66   :  { %v190_v22 = vadd.f32 1.0, %v189_v11  ;;  %v197_v62 = vadd.f32 1.0, %v196_v0 }
  0x67   :  { %v332_v7 = vxor.u32 2147483648, %v331_v43 }
  0x68   :  { %v198_v1 = vmul.f32 %v197_v62, %v182_v41  ;;  %v206_v4 = vxor.u32 2147483648, %v190_v22 }
  0x69   :  { %v333_v10 = vsel %vm212_vm13, %v332_v7, %v331_v43 }
  0x6a   :  { %v203_v8 = vxor.u32 2147483648, %v198_v1  ;;  %v207_v9 = vsel %vm205_vm12, %v206_v4, %v198_v1  ;;  %v336_v6 = vsel %vm918_vm15, %v758_v5, %v333_v10  ;;  %v51_v5 = vld [vmem:[#allocation5 + $0x38] sm:$0xff] }
  0x6b   :  { %v338_v15 = vmul.f32 %v336_v6, %v336_v6 }
  0x6c   :  { %v204_v13 = vsel %vm202_vm14, %v190_v22, %v203_v8 }
  0x6d   :  { %v208_v53 = vsel %vm201_vm1, %v204_v13, %v207_v9  ;;  %v339_v17 = vmul.f32 -0.001358992, %v338_v15  ;;  %v346_v19 = vmul.f32 -0.00019511016, %v338_v15 }
  0x6e   :  { %v209_v16 = vsel %vm199_vm2, nan, %v208_v53 }
  0x6f   :  { %602 = vmatmul.msk.f32.vlgmr.msra.gmra.mxu0 %vm364_vm3, %v209_v16  ;;  %v340_v21 = vadd.f32 0.041655596, %v339_v17  ;;  %v347_v36 = vadd.f32 0.008332121, %v346_v19 }
  0x71   :  { %v341_v26 = vmul.f32 %v340_v21, %v338_v15  ;;  %v348_v18 = vmul.f32 %v347_v36, %v338_v15 }
  0x73   :  { %v342_v27 = vadd.f32 -0.4999988, %v341_v26  ;;  %v349_v56 = vadd.f32 -0.16666654, %v348_v18 }
  0x75   :  { %v343_v28 = vmul.f32 %v342_v27, %v338_v15  ;;  %v350_v30 = vmul.f32 %v349_v56, %v338_v15 }
  0x77   :  { %v344_v32 = vadd.f32 1.0, %v343_v28  ;;  %v351_v34 = vadd.f32 1.0, %v350_v30 }
  0x79   :  { %v352_v37 = vmul.f32 %v351_v34, %v336_v6  ;;  %v360_v38 = vxor.u32 2147483648, %v344_v32 }
  0x7b   :  { %v357_v20 = vxor.u32 2147483648, %v352_v37  ;;  %v361_v29 = vsel %vm359_vm4, %v360_v38, %v352_v37  ;;  %vm466_vm4 = vcmask 31744  }
  0x7d   :  { %v358_v39 = vsel %vm356_vm5, %v344_v32, %v357_v20 }
  0x7e   :  { %v362_v41 = vsel %vm355_vm6, %v358_v39, %v361_v29 }
  0x7f   :  { %v363_v44 = vsel %vm353_vm7, nan, %v362_v41 }
  0x80   :  { %603 = vmatmul.msk.f32.gmra.mxu0 %vm364_vm3, %v363_v44  ;;  %vm468_vm3 = vcmask 24576  }
  0xec   :  { %v392_v46 = vpop.f32.mrf.mxu0 }
  0xed   :  { %v393_v3 = vadd.f32 %v392_v46, %v49_v45 }
  0xef   :  { %420 = vmatpush.msra.mxu1 %v393_v3 }
  0xf0   :  { %604 = vmatmul.msk.f32.vlgmr.msra.gmra.mxu1 %vm398_vm8, %v46_v40 }
  0xf8   :  { %605 = vmatmul.msk.f32.gmra.mxu1 %vm398_vm8, %v47_v48 }
  0xfd   :  { %v395_v50 = vpop.f32.mrf.mxu0 }
  0xfe   :  { %v396_v51 = vadd.f32 %v395_v50, %v50_v49 }
 0x100   :  { %492 = vmatpush.msra.mxu2 %v396_v51 }
 0x101   :  { %608 = vmatmul.msk.f32.vlgmr.msra.gmra.mxu2 %vm398_vm8, %v46_v40 }
 0x109   :  { %609 = vmatmul.msk.f32.gmra.mxu2 %vm398_vm8, %v47_v48 }
 0x16d   :  { %v422_v52 = vpop.f32.mrf.mxu1 }
 0x16e   :  { %v423_v25 = vadd.f32 %v422_v52, %v51_v5 }
 0x170   :  { %v606_v47 = vmul.f32 -1.442695, %v423_v25 }
 0x172   :  { %626 = vpow2.f32 %v606_v47 }
 0x175   :  { %v425_v55 = vpop.f32.mrf.mxu1 }
 0x176   :  { %v426_v57 = vadd.f32 %v425_v55, %v52_v54 }
 0x178   :  { %v607_v31 = vmul.f32 -1.442695, %v426_v57  ;;  %v627_v23 = vpop.eup %626 }
 0x179   :  { %v434_v33 = vadd.f32 1.0, %v627_v23 }
 0x17a   :  { %628 = vpow2.f32 %v607_v31 }
 0x17b   :  { %630 = vrcp.f32 %v434_v33  ;;  %vm441_vm12 = vweird.f32 %v434_v33  ;;  %v447_v15 = vand.u32 2147483648, %v434_v33  ;;  %v445_v19 = vand.u32 2147483647, %v434_v33 }
 0x17d   :  { %v448_v27 = vor.u32 1.1754944e-38, %v447_v15  ;;  %vm446_vm2 = vcmp.eq.f32.partialorder %v445_v19, 8.507059e+37 }
 0x180   :  { %v629_v58 = vpop.eup %628 }
 0x181   :  { %v435_v59 = vadd.f32 1.0, %v629_v58  ;;  %v631_v11 = vpop.eup %630 }
 0x182   :  { %v437_v62 = vmul.f32 %v631_v11, %v434_v33  ;;  %vm442_vm13 = vweird.f32 %v631_v11 }
 0x183   :  { %632 = vrcp.f32 %v435_v59  ;;  %vm456_vm10 = vweird.f32 %v435_v59  ;;  %v462_v14 = vand.u32 2147483648, %v435_v59  ;;  %v460_v53 = vand.u32 2147483647, %v435_v59  ;;  %vm941_vm15 = vmor %vm441_vm12, %vm442_vm13 }
 0x184   :  { %v494_v60 = vpop.f32.mrf.mxu2  ;;  %v438_v12 = vsub.f32 1.0, %v437_v62  ;;  %vm575_vm13 = vcmask 17408  }
 0x185   :  { %v495_v63 = vadd.f32 %v494_v60, %v51_v5  ;;  %v463_v21 = vor.u32 1.1754944e-38, %v462_v14  ;;  %vm461_vm1 = vcmp.eq.f32.partialorder %v460_v53, 8.507059e+37 }
 0x186   :  { %v439_v13 = vmul.f32 %v631_v11, %v438_v12 }
 0x187   :  { %v610_v35 = vmul.f32 -1.442695, %v495_v63 }
 0x188   :  { %v440_v17 = vadd.f32 %v631_v11, %v439_v13 }
 0x189   :  { %v633_v0 = vpop.eup %632  ;;  %634 = vpow2.f32 %v610_v35 }
 0x18a   :  { %v452_v22 = vmul.f32 %v633_v0, %v435_v59  ;;  %vm457_vm11 = vweird.f32 %v633_v0  ;;  %v444_v61 = vsel %vm941_vm15, %v631_v11, %v440_v17 }
 0x18b   :  { %vm937_vm14 = vmor %vm456_vm10, %vm457_vm11  ;;  %v449_v32 = vsel %vm446_vm2, %v448_v27, %v444_v61 }
 0x18c   :  { %v453_v43 = vsub.f32 1.0, %v452_v22  ;;  %v497_v1 = vpop.f32.mrf.mxu2  ;;  %v467_v38 = vsel %vm466_vm4, %v449_v32, -inf }
 0x18d   :  { %v498_v4 = vadd.f32 %v497_v1, %v52_v54 }
 0x18e   :  { %v454_v9 = vmul.f32 %v633_v0, %v453_v43  ;;  %v53_v43 = vld [vmem:[#allocation5 + $0x48] sm:$0x3] }
 0x18f   :  { %v635_v7 = vpop.eup %634  ;;  %v611_v8 = vmul.f32 -1.442695, %v498_v4 }
 0x190   :  { %v506_v10 = vadd.f32 1.0, %v635_v7  ;;  %v455_v6 = vadd.f32 %v633_v0, %v454_v9 }
 0x191   :  { %636 = vpow2.f32 %v611_v8 }
 0x192   :  { %638 = vrcp.f32 %v506_v10  ;;  %v459_v24 = vsel %vm937_vm14, %v633_v0, %v455_v6  ;;  %v519_v44 = vand.u32 2147483648, %v506_v10  ;;  %vm513_vm6 = vweird.f32 %v506_v10 }
 0x193   :  { %v464_v28 = vsel %vm461_vm1, %v463_v21, %v459_v24  ;;  %v517_v46 = vand.u32 2147483647, %v506_v10 }
 0x194   :  { %v469_v34 = vsel %vm468_vm3, %v464_v28, -inf  ;;  %v520_v51 = vor.u32 1.1754944e-38, %v519_v44 }
 0x195   :  { %v470_v29 = vmax.f32 %v467_v38, %v469_v34  ;;  %vm518_vm9 = vcmp.eq.f32.partialorder %v517_v46, 8.507059e+37 }
 0x197   :  { %v637_v36 = vpop.eup %636  ;;  %v471_v3 = vrot.slane %v470_v29, 4 }
 0x198   :  { %v639_v26 = vpop.eup %638  ;;  %v507_v18 = vadd.f32 1.0, %v637_v36 }
 0x199   :  { %v509_v56 = vmul.f32 %v639_v26, %v506_v10  ;;  %vm514_vm5 = vweird.f32 %v639_v26  ;;  %v472_v52 = vmax.f32 %v470_v29, %v471_v3 }
 0x19a   :  { %640 = vrcp.f32 %v507_v18  ;;  %vm515_vm7 = vmor %vm513_vm6, %vm514_vm5  ;;  %v534_v40 = vand.u32 2147483648, %v507_v18  ;;  %v532_v50 = vand.u32 2147483647, %v507_v18  ;;  %vm528_vm10 = vweird.f32 %v507_v18 }
 0x19b   :  { %v510_v30 = vsub.f32 1.0, %v509_v56  ;;  %v473_v23 = vrot.slane %v472_v52, 2 }
 0x19c   :  { %v535_v47 = vor.u32 1.1754944e-38, %v534_v40  ;;  %vm533_vm12 = vcmp.eq.f32.partialorder %v532_v50, 8.507059e+37 }
 0x19d   :  { %v511_v37 = vmul.f32 %v639_v26, %v510_v30  ;;  %v474_v59 = vmax.f32 %v472_v52, %v473_v23 }
 0x19f   :  { %v512_v41 = vadd.f32 %v639_v26, %v511_v37  ;;  %v475_v63 = vrot.slane %v474_v59, 1 }
 0x1a0   :  { %v641_v20 = vpop.eup %640 }
 0x1a1   :  { %v524_v39 = vmul.f32 %v641_v20, %v507_v18  ;;  %v516_v48 = vsel %vm515_vm7, %v639_v26, %v512_v41  ;;  %vm529_vm8 = vweird.f32 %v641_v20  ;;  %v476_v35 = vmax.f32 %v474_v59, %v475_v63 }
 0x1a2   :  { %v521_v25 = vsel %vm518_vm9, %v520_v51, %v516_v48  ;;  %vm530_vm11 = vmor %vm528_vm10, %vm529_vm8 }
 0x1a3   :  { %v525_v45 = vsub.f32 1.0, %v524_v39  ;;  %v538_v57 = vsel %vm466_vm4, %v521_v25, -inf }
 0x1a5   :  { %v526_v49 = vmul.f32 %v641_v20, %v525_v45 }
 0x1a7   :  { %v527_v5 = vadd.f32 %v641_v20, %v526_v49 }
 0x1a9   :  { %v531_v54 = vsel %vm530_vm11, %v641_v20, %v527_v5 }
 0x1aa   :  { %v536_v55 = vsel %vm533_vm12, %v535_v47, %v531_v54 }
 0x1ab   :  { %v539_v31 = vsel %vm468_vm3, %v536_v55, -inf }
 0x1ac   :  { %v540_v33 = vmax.f32 %v538_v57, %v539_v31 }
 0x1ae   :  { %v541_v58 = vrot.slane %v540_v33, 4 }
 0x1b0   :  { %v542_v42 = vmax.f32 %v540_v33, %v541_v58 }
 0x1b2   :  { %v543_v60 = vrot.slane %v542_v42, 2 }
 0x1b4   :  { %v544_v11 = vmax.f32 %v542_v42, %v543_v60 }
 0x1b6   :  { %v545_v0 = vrot.slane %v544_v11, 1 }
 0x1b8   :  { %v546_v22 = vmax.f32 %v544_v11, %v545_v0 }
 0x1ba   :  { %v547_v62 = vsel %vm371_vm0, %v476_v35, %v546_v22 }
 0x1bb   :  { %613 = vmatmul.msk.f32.vlgmr.msra.gmra.mxu3 %vm466_vm4, %v547_v62 }
 0x23e   :  { %v572_v1 = vpop.f32.mrf.mxu3 }
 0x23f   :  { %v573_v4 = vadd.f32 %v572_v1, %v53_v43 }
 0x241   :  { %576 = vst.msk [vmem:[#allocation7] sm:$0x3] %vm575_vm13, %v573_v4 }
 0x242   :  { %587 = dma.vmem_to_hbm [thread:$0]  %s583_s1, 32, %s585_s23, [#allocation4]  }
 0x243   :  { %718 = dma.done.wait [#allocation4], 32  }
 0x244   :  { %719 = vsyncadd [#allocation4], 4294967264 }
 0x245   :  { %592 = vsyncpa [#allocation3], 1 }
 0x246   :  { %593 = vsyncpa [#allocation6], 1 }
 0x247   :  { %594 = vsyncpa [#allocation4], 1 }

</bundles_post_ra>
